<compile_context>
chip_gen: v7x
topology: tpu7x:2x2x1
jax: 0.10.0
libtpu: 0.0.40
codegen_flags: <defaults>
</compile_context>

<pallas_src>
import functools

import jax
import jax.numpy as jnp
import numpy as np
from jax.experimental import pallas as pl
from jax.experimental.pallas import tpu as pltpu


# ----------------------------- kernel ---------------------------------------


def mlp_kernel(x_ref, w1_ref, b1_ref, w2_ref, b2_ref, w3_ref, b3_ref, o_ref):
    # layer 1 + ReLU  (bf16 MXU, f32 accumulate)
    x = x_ref[...].astype(jnp.bfloat16)
    h1 = jnp.dot(x, w1_ref[...], preferred_element_type=jnp.float32)
    h1 = jnp.maximum(h1 + b1_ref[...], 0.0)
    # layer 2 + ReLU
    h2 = jnp.dot(h1.astype(jnp.bfloat16), w2_ref[...],
                 preferred_element_type=jnp.float32)
    h2 = jnp.maximum(h2 + b2_ref[...], 0.0)
    # layer 3 (no activation)
    out = jnp.dot(h2.astype(jnp.bfloat16), w3_ref[...],
                  preferred_element_type=jnp.float32)
    o_ref[...] = (out + b3_ref[...]).astype(o_ref.dtype)


# ----------------------------- wrapper ---------------------------------------


def _round_up(n, m):
    return (n + m - 1) // m * m


def _choose_batch_tiling(B, batch_tile):
    """Pick (tile_b, b_pad) minimizing both padding and grid steps.

    - Single tile when the 8-rounded batch fits in `batch_tile`.
    - Otherwise balance rows across ceil(B / batch_tile) tiles (so padding is
      bounded by ~8 rows/tile, not up to tile_b), and round the tile count up
      to an even number so both v7x TensorCores get work.
    """
    b8 = _round_up(B, 8)
    if b8 <= batch_tile:
        return b8, b8
    n_tiles = -(-B // batch_tile)
    if n_tiles % 2:                       # even tile count -> megacore-friendly
        n_tiles += 1
    tile_b = _round_up(-(-B // n_tiles), 8)
    return tile_b, n_tiles * tile_b


def _resident_spec(arr):
    """Full-array block, constant index, single-buffered -> stays in VMEM."""
    ndim = arr.ndim
    idx_map = lambda i, _n=ndim: (0,) * _n
    try:
        return pl.BlockSpec(arr.shape, idx_map, pipeline_mode=pl.Buffered(1))
    except TypeError:  # older jax without pipeline_mode kwarg
        return pl.BlockSpec(arr.shape, idx_map)


def net_forward(x, padded_params, action_dim=4, batch_tile=512,
                out_dtype=jnp.float32):
    """x: [B, state_dim] f32.  padded_params: lane-padded bf16 W / f32 b."""
    w1, b1, w2, b2, w3, b3 = padded_params
    B, state_dim = x.shape
    h1p, h2p, out_p = w1.shape[1], w2.shape[1], w3.shape[1]

    tile_b, b_pad = _choose_batch_tiling(B, batch_tile)
    if b_pad != B:
        x = jnp.pad(x, ((0, b_pad - B), (0, 0)))

    flops = 2 * b_pad * (state_dim * h1p + h1p * h2p + h2p * out_p)
    bytes_accessed = (
        b_pad * state_dim * x.dtype.itemsize
        + sum(int(np.prod(p.shape)) * p.dtype.itemsize for p in padded_params)
        + b_pad * out_p * jnp.dtype(out_dtype).itemsize)

    out = pl.pallas_call(
        mlp_kernel,
        out_shape=jax.ShapeDtypeStruct((b_pad, out_p), out_dtype),
        grid=(b_pad // tile_b,),
        in_specs=[
            pl.BlockSpec((tile_b, state_dim), lambda i: (i, 0)),
            _resident_spec(w1), _resident_spec(b1),
            _resident_spec(w2), _resident_spec(b2),
            _resident_spec(w3), _resident_spec(b3),
        ],
        out_specs=pl.BlockSpec((tile_b, out_p), lambda i: (i, 0)),
        compiler_params=pltpu.CompilerParams(
            dimension_semantics=("parallel",)),
        cost_estimate=pl.CostEstimate(
            flops=flops, transcendentals=0, bytes_accessed=bytes_accessed),
    )(x, w1, b1, w2, b2, w3, b3)

    return out[:B, :action_dim]


# ----------------------------- params ----------------------------------------


def init_params(key, state_dim=8, action_dim=4, hidden_dim=(400, 300)):
    """f32 params in original shapes, mimicking nn.Linear's U(-1/sqrt(fan_in), .)."""
    dims = [state_dim, hidden_dim[0], hidden_dim[1], action_dim]
    params = []
    for i in range(3):
        fan_in, fan_out = dims[i], dims[i + 1]
        key, kw, kb = jax.random.split(key, 3)
        bound = 1.0 / np.sqrt(fan_in)
        # stored as [in, out] so the kernel computes x @ W (== PyTorch x @ W.T)
        w = jax.random.uniform(kw, (fan_in, fan_out), jnp.float32, -bound, bound)
        b = jax.random.uniform(kb, (1, fan_out), jnp.float32, -bound, bound)
        params.extend([w, b])
    return tuple(params)


def pad_and_cast_params(params):
    """Zero-pad feature dims to lane multiples of 128 and cast weights to bf16."""
    w1, b1, w2, b2, w3, b3 = params

    def pad2(a, rows, cols):
        return jnp.pad(a, ((0, rows - a.shape[0]), (0, cols - a.shape[1])))

    s = w1.shape[0]                         # state_dim (kept as-is, K=8)
    h1p = _round_up(w1.shape[1], 128)       # 400 -> 512
    h2p = _round_up(w2.shape[1], 128)       # 300 -> 384
    ap = _round_up(w3.shape[1], 128)        # 4   -> 128

    w1p = pad2(w1, s, h1p).astype(jnp.bfloat16)
    w2p = pad2(w2, h1p, h2p).astype(jnp.bfloat16)
    w3p = pad2(w3, h2p, ap).astype(jnp.bfloat16)
    b1p = pad2(b1, 1, h1p)                  # f32
    b2p = pad2(b2, 1, h2p)
    b3p = pad2(b3, 1, ap)
    return (w1p, b1p, w2p, b2p, w3p, b3p)


def reference_forward(x, params):
    """Pure-JAX reference replicating the kernel's bf16-in / f32-acc math."""
    w1, b1, w2, b2, w3, b3 = params
    bf = lambda a: a.astype(jnp.bfloat16)
    h1 = jnp.maximum(
        jnp.dot(bf(x), bf(w1), preferred_element_type=jnp.float32) + b1, 0.0)
    h2 = jnp.maximum(
        jnp.dot(bf(h1), bf(w2), preferred_element_type=jnp.float32) + b2, 0.0)
    return jnp.dot(bf(h2), bf(w3), preferred_element_type=jnp.float32) + b3


# ----------------------------- main ------------------------------------------


if __name__ == "__main__":
    key = jax.random.PRNGKey(0)
    key, kx = jax.random.split(key)

    state_dim, action_dim, hidden_dim = 8, 4, (400, 300)
    params = init_params(key, state_dim, action_dim, hidden_dim)
    padded_params = pad_and_cast_params(params)

    fwd = jax.jit(functools.partial(net_forward, action_dim=action_dim))

    # Small inference-style batch (single tile).
    x_small = jax.random.normal(kx, (2, state_dim), jnp.float32)
    out_small = jax.block_until_ready(fwd(x_small, padded_params))
    np.testing.assert_allclose(
        np.asarray(out_small), np.asarray(reference_forward(x_small, params)),
        rtol=1e-3, atol=1e-3)
    assert out_small.shape == (2, action_dim)

    # Training-style batch exercising the balanced multi-tile grid
    # (B=1040, batch_tile=512 -> 4 tiles of 264 rows, even tile count).
    key, kx2 = jax.random.split(key)
    x_big = jax.random.normal(kx2, (1040, state_dim), jnp.float32)
    out_big = jax.block_until_ready(fwd(x_big, padded_params))
    np.testing.assert_allclose(
        np.asarray(out_big), np.asarray(reference_forward(x_big, params)),
        rtol=1e-3, atol=1e-3)
    assert out_big.shape == (1040, action_dim)

    print("KERNEL_OK")
</pallas_src>

<mosaic_0001>
module attributes {stable_mosaic.version = 11 : i64} {
  func.func @mlp_kernel(%arg0: i32, %arg1: memref<8x8xf32, #tpu.memory_space<vmem>>, %arg2: memref<8x512xbf16, #tpu.memory_space<vmem>>, %arg3: memref<1x512xf32, #tpu.memory_space<vmem>>, %arg4: memref<512x384xbf16, #tpu.memory_space<vmem>>, %arg5: memref<1x384xf32, #tpu.memory_space<vmem>>, %arg6: memref<384x128xbf16, #tpu.memory_space<vmem>>, %arg7: memref<1x128xf32, #tpu.memory_space<vmem>>, %arg8: memref<8x128xf32, #tpu.memory_space<vmem>>) attributes {dimension_semantics = [#tpu.dimension_semantics<parallel>], iteration_bounds = array<i64: 1>, scalar_prefetch = 0 : i64, scratch_operands = 0 : i64, tpu.core_type = #tpu.core_type<tc>, window_params = [{transform_indices = @transform_0, window_bounds = array<i64: 8, 8>}, {pipeline_mode = #tpu.pipeline_mode<synchronous>, transform_indices = @transform_1, window_bounds = array<i64: 8, 512>}, {pipeline_mode = #tpu.pipeline_mode<synchronous>, transform_indices = @transform_2, window_bounds = array<i64: 1, 512>}, {pipeline_mode = #tpu.pipeline_mode<synchronous>, transform_indices = @transform_3, window_bounds = array<i64: 512, 384>}, {pipeline_mode = #tpu.pipeline_mode<synchronous>, transform_indices = @transform_4, window_bounds = array<i64: 1, 384>}, {pipeline_mode = #tpu.pipeline_mode<synchronous>, transform_indices = @transform_5, window_bounds = array<i64: 384, 128>}, {pipeline_mode = #tpu.pipeline_mode<synchronous>, transform_indices = @transform_6, window_bounds = array<i64: 1, 128>}, {transform_indices = @transform_7, window_bounds = array<i64: 8, 128>}]} {
    %c0 = arith.constant 0 : index
    %c0_0 = arith.constant 0 : index
    %0 = vector.load %arg1[%c0, %c0_0] : memref<8x8xf32, #tpu.memory_space<vmem>>, vector<8x8xf32>
    %1 = arith.truncf %0 : vector<8x8xf32> to vector<8x8xbf16>
    %c0_1 = arith.constant 0 : index
    %c0_2 = arith.constant 0 : index
    %2 = vector.load %arg2[%c0_1, %c0_2] : memref<8x512xbf16, #tpu.memory_space<vmem>>, vector<8x512xbf16>
    %cst = arith.constant dense<0.000000e+00> : vector<8x512xf32>
    %3 = tpu.matmul %1, %2, %cst {dimension_numbers = #tpu.dot_dimension_numbers<[1], [0], [0], [1], [0, 0, 1, 1], [], []>} : vector<8x8xbf16>, vector<8x512xbf16>, vector<8x512xf32> -> vector<8x512xf32>
    %c0_3 = arith.constant 0 : index
    %c0_4 = arith.constant 0 : index
    %4 = vector.load %arg3[%c0_3, %c0_4] : memref<1x512xf32, #tpu.memory_space<vmem>>, vector<1x512xf32>
    %5 = vector.broadcast %4 : vector<1x512xf32> to vector<8x512xf32>
    %6 = arith.addf %3, %5 : vector<8x512xf32>
    %cst_5 = arith.constant 0.000000e+00 : f32
    %7 = vector.broadcast %cst_5 : f32 to vector<8x512xf32>
    %8 = arith.maximumf %6, %7 : vector<8x512xf32>
    %9 = arith.truncf %8 : vector<8x512xf32> to vector<8x512xbf16>
    %c0_6 = arith.constant 0 : index
    %c0_7 = arith.constant 0 : index
    %10 = vector.load %arg4[%c0_6, %c0_7] : memref<512x384xbf16, #tpu.memory_space<vmem>>, vector<512x384xbf16>
    %cst_8 = arith.constant dense<0.000000e+00> : vector<8x384xf32>
    %11 = tpu.matmul %9, %10, %cst_8 {dimension_numbers = #tpu.dot_dimension_numbers<[1], [0], [0], [1], [0, 0, 1, 1], [], []>} : vector<8x512xbf16>, vector<512x384xbf16>, vector<8x384xf32> -> vector<8x384xf32>
    %c0_9 = arith.constant 0 : index
    %c0_10 = arith.constant 0 : index
    %12 = vector.load %arg5[%c0_9, %c0_10] : memref<1x384xf32, #tpu.memory_space<vmem>>, vector<1x384xf32>
    %13 = vector.broadcast %12 : vector<1x384xf32> to vector<8x384xf32>
    %14 = arith.addf %11, %13 : vector<8x384xf32>
    %cst_11 = arith.constant 0.000000e+00 : f32
    %15 = vector.broadcast %cst_11 : f32 to vector<8x384xf32>
    %16 = arith.maximumf %14, %15 : vector<8x384xf32>
    %17 = arith.truncf %16 : vector<8x384xf32> to vector<8x384xbf16>
    %c0_12 = arith.constant 0 : index
    %c0_13 = arith.constant 0 : index
    %18 = vector.load %arg6[%c0_12, %c0_13] : memref<384x128xbf16, #tpu.memory_space<vmem>>, vector<384x128xbf16>
    %cst_14 = arith.constant dense<0.000000e+00> : vector<8x128xf32>
    %19 = tpu.matmul %17, %18, %cst_14 {dimension_numbers = #tpu.dot_dimension_numbers<[1], [0], [0], [1], [0, 0, 1, 1], [], []>} : vector<8x384xbf16>, vector<384x128xbf16>, vector<8x128xf32> -> vector<8x128xf32>
    %c0_15 = arith.constant 0 : index
    %c0_16 = arith.constant 0 : index
    %20 = vector.load %arg7[%c0_15, %c0_16] : memref<1x128xf32, #tpu.memory_space<vmem>>, vector<1x128xf32>
    %21 = vector.broadcast %20 : vector<1x128xf32> to vector<8x128xf32>
    %22 = arith.addf %19, %21 : vector<8x128xf32>
    %c0_17 = arith.constant 0 : index
    %c0_18 = arith.constant 0 : index
    %23 = vector.load %arg8[%c0_17, %c0_18] : memref<8x128xf32, #tpu.memory_space<vmem>>, vector<8x128xf32>
    tpu.vector_store %arg8[%c0_17, %c0_18], %22 {strides = array<i32>} : memref<8x128xf32, #tpu.memory_space<vmem>>, vector<8x128xf32>,
    return
  }
  func.func @transform_0(%arg0: i32) -> (i32, i32) {
    %c0_i32 = arith.constant 0 : i32
    %c0_i32_0 = arith.constant 0 : i32
    return %arg0, %c0_i32 : i32, i32
  }
  func.func @transform_1(%arg0: i32) -> (i32, i32) {
    %c0_i32 = arith.constant 0 : i32
    %c0_i32_0 = arith.constant 0 : i32
    %c0_i32_1 = arith.constant 0 : i32
    return %c0_i32, %c0_i32_0 : i32, i32
  }
  func.func @transform_2(%arg0: i32) -> (i32, i32) {
    %c0_i32 = arith.constant 0 : i32
    %c0_i32_0 = arith.constant 0 : i32
    %c0_i32_1 = arith.constant 0 : i32
    return %c0_i32, %c0_i32_0 : i32, i32
  }
  func.func @transform_3(%arg0: i32) -> (i32, i32) {
    %c0_i32 = arith.constant 0 : i32
    %c0_i32_0 = arith.constant 0 : i32
    %c0_i32_1 = arith.constant 0 : i32
    return %c0_i32, %c0_i32_0 : i32, i32
  }
  func.func @transform_4(%arg0: i32) -> (i32, i32) {
    %c0_i32 = arith.constant 0 : i32
    %c0_i32_0 = arith.constant 0 : i32
    %c0_i32_1 = arith.constant 0 : i32
    return %c0_i32, %c0_i32_0 : i32, i32
  }
  func.func @transform_5(%arg0: i32) -> (i32, i32) {
    %c0_i32 = arith.constant 0 : i32
    %c0_i32_0 = arith.constant 0 : i32
    %c0_i32_1 = arith.constant 0 : i32
    return %c0_i32, %c0_i32_0 : i32, i32
  }
  func.func @transform_6(%arg0: i32) -> (i32, i32) {
    %c0_i32 = arith.constant 0 : i32
    %c0_i32_0 = arith.constant 0 : i32
    %c0_i32_1 = arith.constant 0 : i32
    return %c0_i32, %c0_i32_0 : i32, i32
  }
  func.func @transform_7(%arg0: i32) -> (i32, i32) {
    %c0_i32 = arith.constant 0 : i32
    %c0_i32_0 = arith.constant 0 : i32
    return %arg0, %c0_i32 : i32, i32
  }
}

</mosaic_0001>

<bundles_post_ra>
// kernel: net_forward.1
= control target key start
LH: loop header
LB: loop body
LE: loop exit
PB: predicated region body
PF: predicated region fallthrough
CT: control target
= control target key end

     0   :  { %12 = vsyncpa [#allocation3], 0  ;;  %s1914_s0 = inlined_call_operand.vmem [shape: f32[8,8], index: 0, kind: input, shape index: {}]   ;;  %s1915_s1 = inlined_call_operand.hbm [shape: bf16[8,512], index: 1, kind: input, shape index: {}]   ;;  %s1916_s2 = inlined_call_operand.vmem [shape: f32[1,512], index: 2, kind: input, shape index: {}]   ;;  %s1917_s3 = inlined_call_operand.hbm [shape: bf16[512,384], index: 3, kind: input, shape index: {}]   ;;  %s1918_s4 = inlined_call_operand.vmem [shape: f32[1,384], index: 4, kind: input, shape index: {}]   ;;  %s1919_s5 = inlined_call_operand.hbm [shape: bf16[384,128], index: 5, kind: input, shape index: {}]   ;;  %s1920_s6 = inlined_call_operand.vmem [shape: f32[1,128], index: 6, kind: input, shape index: {}]   ;;  %s1921_s7 = inlined_call_operand.vmem [shape: f32[8,128], index: 7, kind: output, shape index: {}]  }
   0x1   :  { %13 = vsyncpa [#allocation5], 0  ;;  %s1786_s24 = smov [#allocation4]   ;;  %s1716_s28 = scalar_lea.hbm %s1917_s3, 12288 }
   0x2   :  { %s33_s25 = sshll.u32 %s1786_s24, 4  ;;  %p1717_p0 = scmp.ne.s32.totalorder %s1917_s3, %s1716_s28  ;;  %s34_s25 = int_to_ptr.vmem [resolvable:$true] %s33_s25 }
   0x3   :  { %p1720_p1 = scmp.lt.u32.totalorder %s1716_s28, %s1917_s3 }
   0x5   :  { %p1722_p2 = pnand %p1720_p1, %p1717_p0 }
   0x7   :  { %1725 = shalt.err (!%p1722_p2)
}
   0x8   :  { %s1726_s10 = scalar_lea.vmem %s34_s25, 12288  ;;  %p1731_p4 = scmp.lt.s32.totalorder %s34_s25, %s34_s25 }
   0x9   :  { %p1727_p3 = scmp.ne.s32.totalorder %s34_s25, %s1726_s10  ;;  %p1732_p5 = scmp.lt.s32.totalorder %s1726_s10, %s1726_s10 }
   0xb   :  { %p1733_p6 = por %p1732_p5, %p1731_p4 }
   0xd   :  { %p1734_p7 = pnand %p1733_p6, %p1727_p3 }
   0xf   :  { %1737 = shalt.err (!%p1734_p7)
}
  0x10   :  { %s1787_s11 = smov 192   ;;  %s1788_s12 = smov 12  }
  0x11   :  { %39 = dma.hbm_to_vmem [thread:$0]  %s1917_s3, 12288, %s34_s25, [#allocation5], %s1787_s11, %s1787_s11, %s1788_s12  }
  0x12   :  { %s1789_s15 = smov [#allocation2]   ;;  %s1790_s17 = smov [#allocation6]  }
  0x13   :  { %s22_s16 = sshll.u32 %s1789_s15, 4  ;;  %s47_s18 = sshll.u32 %s1790_s17, 4  ;;  %s23_s16 = int_to_ptr.vmem [resolvable:$true] %s22_s16  ;;  %s48_s18 = int_to_ptr.vmem [resolvable:$true] %s47_s18 }
  0x14   :  { %s1738_s21 = scalar_lea.hbm %s1915_s1, 256 }
  0x15   :  { %p1739_p8 = scmp.ne.s32.totalorder %s1915_s1, %s1738_s21  ;;  %p1742_p9 = scmp.lt.u32.totalorder %s1738_s21, %s1915_s1 }
  0x17   :  { %p1744_p10 = pnand %p1742_p9, %p1739_p8 }
  0x19   :  { %1747 = shalt.err (!%p1744_p10)
}
  0x1a   :  { %s1748_s3 = scalar_lea.vmem %s23_s16, 256  ;;  %p1753_p12 = scmp.lt.s32.totalorder %s23_s16, %s23_s16 }
  0x1b   :  { %p1749_p11 = scmp.ne.s32.totalorder %s23_s16, %s1748_s3  ;;  %p1754_p13 = scmp.lt.s32.totalorder %s1748_s3, %s1748_s3 }
  0x1d   :  { %p1755_p0 = por %p1754_p13, %p1753_p12 }
  0x1f   :  { %p1756_p1 = pnand %p1755_p0, %p1749_p11 }
  0x21   :  { %1759 = shalt.err (!%p1756_p1)
}
  0x22   :  { %25 = dma.hbm_to_vmem [thread:$0]  %s1915_s1, 256, %s23_s16, [#allocation3]  }
  0x23   :  { %s1760_s30 = scalar_lea.hbm %s1919_s5, 3072 }
  0x24   :  { %p1761_p2 = scmp.ne.s32.totalorder %s1919_s5, %s1760_s30  ;;  %p1764_p3 = scmp.lt.u32.totalorder %s1760_s30, %s1919_s5 }
  0x26   :  { %p1766_p4 = pnand %p1764_p3, %p1761_p2 }
  0x28   :  { %1769 = shalt.err (!%p1766_p4)
}
  0x29   :  { %s1770_s12 = scalar_lea.vmem %s48_s18, 3072  ;;  %p1775_p6 = scmp.lt.s32.totalorder %s48_s18, %s48_s18 }
  0x2a   :  { %p1771_p5 = scmp.ne.s32.totalorder %s48_s18, %s1770_s12  ;;  %p1776_p7 = scmp.lt.s32.totalorder %s1770_s12, %s1770_s12 }
  0x2c   :  { %p1777_p8 = por %p1776_p7, %p1775_p6 }
  0x2e   :  { %p1778_p9 = pnand %p1777_p8, %p1771_p5 }
  0x30   :  { %1781 = shalt.err (!%p1778_p9)
}
  0x31   :  { %s1791_s1 = smov 64   ;;  %s1792_s13 = smov 4  }
  0x32   :  { %53 = dma.hbm_to_vmem [thread:$0]  %s1919_s5, 3072, %s48_s18, [#allocation5], %s1791_s1, %s1791_s1, %s1792_s13  }
  0x33   :  { %1782 = dma.done.wait [#allocation3], 256  }
  0x34   :  { %1783 = vsyncadd [#allocation3], 4294967040 }
  0x35   :  { %1784 = dma.done.wait [#allocation5], 15360  }
  0x36   :  { %1785 = vsyncadd [#allocation5], 4294951936  ;;  %v1793_v0 = vmov 0   ;;  %v68_v1 = vld [vmem:[#allocation2] sm:$0xff]  ;;  %vm106_vm0 = vcmask 1043456   ;;  %v69_v3 = vld [vmem:[#allocation2 + $0x8] sm:$0xff]  ;;  %v72_v61 = vlaneseq }
  0x37   :  { %151 = vmatprep.mubr.bf16.mxu0 %v1793_v0  ;;  %192 = vmatprep.mubr.bf16.mxu1 %v1793_v0  ;;  %v66_v2 = vld [vmem:[%s1914_s0] sm:$0xff]  ;;  %v1321_v4 = vcombine.high %v68_v1, %v68_v1  ;;  %v1320_v5 = vcombine.low %v68_v1, %v68_v1  ;;  %v1323_v6 = vcombine.high %v69_v3, %v69_v3  ;;  %vm102_vm1 = vcmask 64512   ;;  %v1564_v12 = vld [vmem:[#allocation4] ss:$12 sps:$4 sm:$0xff]   ;;  %v1569_v13 = vld [vmem:[#allocation4 + $0x1c] ss:$12 sps:$4 sm:$0xff]  }
  0x38   :  { %v1322_v7 = vcombine.low %v69_v3, %v69_v3  ;;  %v1566_v8 = vld [vmem:[#allocation4 + $0x4] ss:$12 sps:$4 sm:$0xff]   ;;  %v67_v10 = vpack.c.bf16 %v66_v2, %v66_v2  ;;  %v1572_v15 = vld [vmem:[#allocation4 + $0x34] ss:$12 sps:$4 sm:$0xff]   ;;  %v1575_v17 = vld [vmem:[#allocation4 + $0x4c] ss:$12 sps:$4 sm:$0xff]  }
  0x39   :  { %1324 = vmatprep.subr.msk.bf16.mxu0 %vm106_vm0, %v1321_v4  ;;  %v108_v9 = vsel %vm106_vm0, %v1320_v5, 0  ;;  %1326 = vmatprep.subr.msk.bf16.mxu1 %vm106_vm0, %v1323_v6  ;;  %v1567_v14 = vld [vmem:[#allocation4 + $0x18] ss:$12 sps:$4 sm:$0xff]   ;;  %v1570_v16 = vld [vmem:[#allocation4 + $0x30] ss:$12 sps:$4 sm:$0xff]   ;;  %v1875_v62 = vshrl.u32 %v72_v61, 7 }
  0x3a   :  { %120 = vmatpush1.bf16.msra.mxu0 %v108_v9  ;;  %v114_v11 = vsel %vm106_vm0, %v1322_v7, 0  ;;  %v1591_v18 = vld [vmem:[#allocation4 + $0xc8] ss:$12 sps:$4 sm:$0xff]   ;;  %v1578_v21 = vld [vmem:[#allocation4 + $0x64] ss:$12 sps:$4 sm:$0xff]   ;;  %vm1795_vm2 = vmmov 0  }
  0x3b   :  { %161 = vmatpush1.bf16.msra.mxu1 %v114_v11  ;;  %866 = vmatprep.subr.bf16.mxu0 %v1566_v8  ;;  %v1592_v19 = vld [vmem:[#allocation4 + $0x8] ss:$12 sps:$4 sm:$0xff]   ;;  %v1596_v22 = vld [vmem:[#allocation4 + $0xe0] ss:$12 sps:$4 sm:$0xff]   ;;  %v1601_v26 = vld [vmem:[#allocation4 + $0xf8] ss:$12 sps:$4 sm:$0xff]  }
  0x3c   :  { %v1573_v20 = vld [vmem:[#allocation4 + $0x48] ss:$12 sps:$4 sm:$0xff]   ;;  %1449 = vmatprep.subr.bf16.mxu1 %v1591_v18  ;;  %v1597_v23 = vld [vmem:[#allocation4 + $0x20] ss:$12 sps:$4 sm:$0xff]   ;;  %v1602_v27 = vld [vmem:[#allocation4 + $0x38] ss:$12 sps:$4 sm:$0xff]  }
  0x3d   :  { %1325 = vmatmul.mubr.msk.bf16.vlgmr.msra.gmra.mrb[0].mxu0 %vm102_vm1, %v67_v10  ;;  %v1576_v24 = vld [vmem:[#allocation4 + $0x60] ss:$12 sps:$4 sm:$0xff]   ;;  %v1581_v25 = vld [vmem:[#allocation4 + $0x7c] ss:$12 sps:$4 sm:$0xff]   ;;  %v1579_v28 = vld [vmem:[#allocation4 + $0x78] ss:$12 sps:$4 sm:$0xff]  }
  0x3e   :  { %1327 = vmatmul.mubr.msk.bf16.vlgmr.msra.gmra.mrb[0].mxu1 %vm102_vm1, %v67_v10  ;;  %867 = vmatpush1.bf16.msra.mxu0 %v1564_v12  ;;  %v1606_v29 = vld [vmem:[#allocation4 + $0x110] ss:$12 sps:$4 sm:$0xff]   ;;  %v1584_v31 = vld [vmem:[#allocation4 + $0x94] ss:$12 sps:$4 sm:$0xff]   ;;  %v1587_v35 = vld [vmem:[#allocation4 + $0xac] ss:$12 sps:$4 sm:$0xff]  }
  0x3f   :  { %868 = vmatprep.subr.bf16.mxu0 %v1569_v13  ;;  %1450 = vmatpush3.bf16.msra.mxu1 %v1592_v19  ;;  %v1607_v30 = vld [vmem:[#allocation4 + $0x50] ss:$12 sps:$4 sm:$0xff]   ;;  %v1611_v33 = vld [vmem:[#allocation4 + $0x128] ss:$12 sps:$4 sm:$0xff]   ;;  %v1616_v37 = vld [vmem:[#allocation4 + $0x140] ss:$12 sps:$4 sm:$0xff]  }
  0x40   :  { %1451 = vmatprep.subr.bf16.mxu1 %v1596_v22  ;;  %v1582_v32 = vld [vmem:[#allocation4 + $0x90] ss:$12 sps:$4 sm:$0xff]   ;;  %v1612_v34 = vld [vmem:[#allocation4 + $0x68] ss:$12 sps:$4 sm:$0xff]   ;;  %v1617_v39 = vld [vmem:[#allocation4 + $0x80] ss:$12 sps:$4 sm:$0xff]  }
  0x41   :  { %v1585_v36 = vld [vmem:[#allocation4 + $0xa8] ss:$12 sps:$4 sm:$0xff]   ;;  %v1590_v38 = vld [vmem:[#allocation4 + $0xc4] ss:$12 sps:$4 sm:$0xff]   ;;  %v1588_v40 = vld [vmem:[#allocation4 + $0xc0] ss:$12 sps:$4 sm:$0xff]  }
  0x42   :  { %869 = vmatpush1.bf16.msra.mxu0 %v1567_v14  ;;  %v1595_v41 = vld [vmem:[#allocation4 + $0xdc] ss:$12 sps:$4 sm:$0xff]   ;;  %v1593_v42 = vld [vmem:[#allocation4 + $0xd8] ss:$12 sps:$4 sm:$0xff]   ;;  %v1600_v43 = vld [vmem:[#allocation4 + $0xf4] ss:$12 sps:$4 sm:$0xff]  }
  0x43   :  { %870 = vmatprep.subr.bf16.mxu0 %v1572_v15  ;;  %1452 = vmatpush3.bf16.msra.mxu1 %v1597_v23  ;;  %v1598_v44 = vld [vmem:[#allocation4 + $0xf0] ss:$12 sps:$4 sm:$0xff]   ;;  %v1605_v45 = vld [vmem:[#allocation4 + $0x10c] ss:$12 sps:$4 sm:$0xff]   ;;  %v1603_v46 = vld [vmem:[#allocation4 + $0x108] ss:$12 sps:$4 sm:$0xff]  }
  0x44   :  { %1453 = vmatprep.subr.bf16.mxu1 %v1601_v26  ;;  %v1610_v47 = vld [vmem:[#allocation4 + $0x124] ss:$12 sps:$4 sm:$0xff]   ;;  %v1608_v48 = vld [vmem:[#allocation4 + $0x120] ss:$12 sps:$4 sm:$0xff]   ;;  %v1615_v49 = vld [vmem:[#allocation4 + $0x13c] ss:$12 sps:$4 sm:$0xff]  }
  0x45   :  { %v1613_v50 = vld [vmem:[#allocation4 + $0x138] ss:$12 sps:$4 sm:$0xff]   ;;  %v1620_v51 = vld [vmem:[#allocation4 + $0x154] ss:$12 sps:$4 sm:$0xff]   ;;  %v1618_v53 = vld [vmem:[#allocation4 + $0x150] ss:$12 sps:$4 sm:$0xff]  }
  0x46   :  { %871 = vmatpush1.bf16.msra.mxu0 %v1570_v16  ;;  %v1621_v52 = vld [vmem:[#allocation4 + $0x158] ss:$12 sps:$4 sm:$0xff]   ;;  %v1626_v56 = vld [vmem:[#allocation4 + $0x170] ss:$12 sps:$4 sm:$0xff]   ;;  %v1623_v57 = vld [vmem:[#allocation4 + $0x168] ss:$12 sps:$4 sm:$0xff]  }
  0x47   :  { %872 = vmatprep.subr.bf16.mxu0 %v1575_v17  ;;  %1454 = vmatpush3.bf16.msra.mxu1 %v1602_v27  ;;  %v1622_v54 = vld [vmem:[#allocation4 + $0x98] ss:$12 sps:$4 sm:$0xff]   ;;  %v1627_v58 = vld [vmem:[#allocation4 + $0xb0] ss:$12 sps:$4 sm:$0xff]   ;;  %v1631_v60 = vld [vmem:[#allocation4 + $0x248] ss:$12 sps:$4 sm:$0xff]  }
  0x48   :  { %1455 = vmatprep.subr.bf16.mxu1 %v1606_v29  ;;  %v1625_v55 = vld [vmem:[#allocation4 + $0x16c] ss:$12 sps:$4 sm:$0xff]   ;;  %v1630_v59 = vld [vmem:[#allocation4 + $0x184] ss:$12 sps:$4 sm:$0xff]   ;;  %v74_v63 = vsub.s32 0, %v1875_v62  ;;  %v78_v1 = vsub.s32 1, %v1875_v62 }
  0x49   :  { %v1881_v0 = vld [vmem:[%s1916_s2] sm:$0xf]  ;;  %v86_v2 = vsub.s32 3, %v1875_v62  ;;  %v1632_v22 = vld [vmem:[#allocation4 + $0x188] ss:$12 sps:$4 sm:$0xff]  }
  0x4a   :  { %873 = vmatpush1.bf16.msra.mxu0 %v1573_v20  ;;  %v75_v3 = vrot.slane %v1881_v0, %v74_v63  ;;  %v79_v4 = vrot.slane %v1881_v0, %v78_v1  ;;  %v1633_v27 = vld [vmem:[#allocation4 + $0x198] ss:$12 sps:$4 sm:$0xff]   ;;  %v1640_v29 = vld [vmem:[#allocation4 + $0x1b4] ss:$12 sps:$4 sm:$0xff]  }
  0x4b   :  { %874 = vmatprep.subr.bf16.mxu0 %v1578_v21  ;;  %1456 = vmatpush3.bf16.msra.mxu1 %v1607_v30  ;;  %v87_v5 = vrot.slane %v1881_v0, %v86_v2  ;;  %v1628_v21 = vld [vmem:[#allocation4 + $0x180] ss:$12 sps:$4 sm:$0xff]   ;;  %v1641_v30 = vld [vmem:[#allocation4 + $0x278] ss:$12 sps:$4 sm:$0xff]   ;;  %v1674_v2 = vld [vmem:[#allocation4 + $0x270] ss:$12 sps:$4 sm:$0xff]  }
  0x4c   :  { %1457 = vmatprep.subr.bf16.mxu1 %v1611_v33  ;;  %v1645_v33 = vld [vmem:[#allocation4 + $0x1cc] ss:$12 sps:$4 sm:$0xff]  }
  0x4d   :  { %v1671_v61 = vld [vmem:[#allocation4 + $0x258] ss:$12 sps:$4 sm:$0xff]  }
  0x4e   :  { %875 = vmatpush1.bf16.msra.mxu0 %v1576_v24  ;;  %v1635_v24 = vld [vmem:[#allocation4 + $0x19c] ss:$12 sps:$4 sm:$0xff]  }
  0x4f   :  { %876 = vmatprep.subr.bf16.mxu0 %v1581_v25  ;;  %1458 = vmatpush3.bf16.msra.mxu1 %v1612_v34  ;;  %v1636_v25 = vld [vmem:[#allocation4 + $0x260] ss:$12 sps:$4 sm:$0xff]   ;;  %v1646_v34 = vld [vmem:[#allocation4 + $0x290] ss:$12 sps:$4 sm:$0xff]  }
  0x50   :  { %1459 = vmatprep.subr.bf16.mxu1 %v1616_v37  ;;  %v1650_v37 = vld [vmem:[#allocation4 + $0x1e4] ss:$12 sps:$4 sm:$0xff]  }
  0x52   :  { %877 = vmatpush1.bf16.msra.mxu0 %v1579_v28  ;;  %v1637_v28 = vld [vmem:[#allocation4 + $0x1a0] ss:$12 sps:$4 sm:$0xff]  }
  0x53   :  { %878 = vmatprep.subr.bf16.mxu0 %v1584_v31  ;;  %1460 = vmatpush3.bf16.msra.mxu1 %v1617_v39  ;;  %v1638_v31 = vld [vmem:[#allocation4 + $0x1b0] ss:$12 sps:$4 sm:$0xff]   ;;  %v82_v39 = vsub.s32 2, %v1875_v62 }
  0x54   :  { %1461 = vmatprep.subr.bf16.mxu1 %v1621_v52  ;;  %v1665_v52 = vld [vmem:[#allocation4 + $0x22c] ss:$12 sps:$4 sm:$0xff]   ;;  %v1710_v62 = vld [vmem:[#allocation6 + $0x90] sm:$0xff]  }
  0x56   :  { %879 = vmatpush1.bf16.msra.mxu0 %v1582_v32  ;;  %v1642_v32 = vld [vmem:[#allocation4 + $0x1b8] ss:$12 sps:$4 sm:$0xff]  }
  0x57   :  { %880 = vmatprep.subr.bf16.mxu0 %v1587_v35  ;;  %1462 = vmatpush3.bf16.msra.mxu1 %v1622_v54  ;;  %v1643_v35 = vld [vmem:[#allocation4 + $0x1c8] ss:$12 sps:$4 sm:$0xff]  }
  0x58   :  { %1463 = vmatprep.subr.bf16.mxu1 %v1626_v56  ;;  %v1667_v56 = vld [vmem:[#allocation4 + $0x230] ss:$12 sps:$4 sm:$0xff]  }
  0x5a   :  { %881 = vmatpush1.bf16.msra.mxu0 %v1585_v36  ;;  %v1647_v36 = vld [vmem:[#allocation4 + $0x1d0] ss:$12 sps:$4 sm:$0xff]  }
  0x5b   :  { %882 = vmatprep.subr.bf16.mxu0 %v1590_v38  ;;  %1464 = vmatpush3.bf16.msra.mxu1 %v1627_v58  ;;  %v1651_v38 = vld [vmem:[#allocation4 + $0x2a8] ss:$12 sps:$4 sm:$0xff]  }
  0x5c   :  { %1471 = vmatprep.subr.bf16.mxu1 %v1631_v60  ;;  %v1673_v60 = vld [vmem:[#allocation4 + $0x25c] ss:$12 sps:$4 sm:$0xff]  }
  0x5e   :  { %883 = vmatpush1.bf16.msra.mxu0 %v1588_v40  ;;  %v1648_v40 = vld [vmem:[#allocation4 + $0x1e0] ss:$12 sps:$4 sm:$0xff]  }
  0x5f   :  { %884 = vmatprep.subr.bf16.mxu0 %v1595_v41  ;;  %v1652_v41 = vld [vmem:[#allocation4 + $0x1e8] ss:$12 sps:$4 sm:$0xff]  }
  0x62   :  { %885 = vmatpush1.bf16.msra.mxu0 %v1593_v42  ;;  %v1655_v42 = vld [vmem:[#allocation4 + $0x1fc] ss:$12 sps:$4 sm:$0xff]  }
  0x63   :  { %886 = vmatprep.subr.bf16.mxu0 %v1600_v43  ;;  %v1656_v43 = vld [vmem:[#allocation4 + $0x2c0] ss:$12 sps:$4 sm:$0xff]  }
  0x66   :  { %887 = vmatpush1.bf16.msra.mxu0 %v1598_v44  ;;  %v83_v44 = vrot.slane %v1881_v0, %v82_v39  ;;  %v1676_v0 = vld [vmem:[#allocation4 + $0x274] ss:$12 sps:$4 sm:$0xff]  }
  0x67   :  { %888 = vmatprep.subr.bf16.mxu0 %v1605_v45  ;;  %v1653_v45 = vld [vmem:[#allocation4 + $0x1f8] ss:$12 sps:$4 sm:$0xff]  }
  0x6a   :  { %889 = vmatpush1.bf16.msra.mxu0 %v1603_v46  ;;  %v1657_v46 = vld [vmem:[#allocation4 + $0x200] ss:$12 sps:$4 sm:$0xff]  }
  0x6b   :  { %890 = vmatprep.subr.bf16.mxu0 %v1610_v47  ;;  %v1660_v47 = vld [vmem:[#allocation4 + $0x214] ss:$12 sps:$4 sm:$0xff]  }
  0x6e   :  { %891 = vmatpush1.bf16.msra.mxu0 %v1608_v48  ;;  %v1661_v48 = vld [vmem:[#allocation4 + $0x2d8] ss:$12 sps:$4 sm:$0xff]  }
  0x6f   :  { %892 = vmatprep.subr.bf16.mxu0 %v1615_v49 }
  0x72   :  { %893 = vmatpush1.bf16.msra.mxu0 %v1613_v50  ;;  %v1658_v50 = vld [vmem:[#allocation4 + $0x210] ss:$12 sps:$4 sm:$0xff]  }
  0x73   :  { %894 = vmatprep.subr.bf16.mxu0 %v1620_v51  ;;  %v1662_v51 = vld [vmem:[#allocation4 + $0x218] ss:$12 sps:$4 sm:$0xff]  }
  0x76   :  { %895 = vmatpush1.bf16.msra.mxu0 %v1618_v53  ;;  %v1666_v53 = vld [vmem:[#allocation4 + $0x2f0] ss:$12 sps:$4 sm:$0xff]  }
  0x77   :  { %896 = vmatprep.subr.bf16.mxu0 %v1625_v55  ;;  %v1663_v55 = vld [vmem:[#allocation4 + $0x228] ss:$12 sps:$4 sm:$0xff]  }
  0x7a   :  { %897 = vmatpush1.bf16.msra.mxu0 %v1623_v57  ;;  %v1670_v57 = vld [vmem:[#allocation4 + $0x244] ss:$12 sps:$4 sm:$0xff]  }
  0x7b   :  { %907 = vmatprep.subr.bf16.mxu0 %v1630_v59  ;;  %v1668_v59 = vld [vmem:[#allocation4 + $0x240] ss:$12 sps:$4 sm:$0xff]  }
 0x110   :  { %v153_v6 = vpop.f32.mrb[0].mxu0 }
 0x111   :  { %v154_v7 = vadd.f32 %v153_v6, %v75_v3  ;;  %v155_v8 = vpop.f32.mrb[1].mxu0  ;;  %v1892_v9 = vpop.f32.mrb[0].mxu1  ;;  %v1679_v3 = vld [vmem:[#allocation4 + $0x28c] ss:$12 sps:$4 sm:$0xff]  }
 0x112   :  { %v156_v10 = vadd.f32 %v155_v8, %v79_v4  ;;  %v157_v11 = vpop.f32.mrb[2].mxu0  ;;  %v196_v12 = vpop.f32.mrb[1].mxu1  ;;  %v195_v49 = vadd.f32 %v1892_v9, %v83_v44  ;;  %v1677_v4 = vld [vmem:[#allocation4 + $0x288] ss:$12 sps:$4 sm:$0xff]   ;;  %v1680_v6 = vld [vmem:[#allocation4 + $0x2a0] ss:$12 sps:$4 sm:$0xff]  }
 0x113   :  { %v201_v13 = vmax.f32 %v154_v7, 0.0  ;;  %v158_v14 = vpop.f32.mrb[3].mxu0  ;;  %v197_v15 = vadd.f32 %v196_v12, %v87_v5  ;;  %v198_v16 = vpop.f32.mrb[2].mxu1  ;;  %v1682_v5 = vld [vmem:[#allocation4 + $0x2a4] ss:$12 sps:$4 sm:$0xff]  }
 0x114   :  { %v202_v17 = vmax.f32 %v156_v10, 0.0  ;;  %v199_v18 = vpop.f32.mrb[3].mxu1  ;;  %v203_v54 = vmax.f32 %v195_v49, 0.0  ;;  %v1685_v7 = vld [vmem:[#allocation4 + $0x2bc] ss:$12 sps:$4 sm:$0xff]   ;;  %v1693_v14 = vld [vmem:[#allocation6] sm:$0xff]  }
 0x115   :  { %v204_v19 = vmax.f32 %v197_v15, 0.0  ;;  %v205_v23 = vpack.c.bf16 %v201_v13, %v201_v13  ;;  %v1683_v8 = vld [vmem:[#allocation4 + $0x2b8] ss:$12 sps:$4 sm:$0xff]   ;;  %v1688_v9 = vld [vmem:[#allocation4 + $0x2d4] ss:$12 sps:$4 sm:$0xff]   ;;  %v1694_v15 = vld [vmem:[#allocation6 + $0x48] sm:$0xff]  }
 0x116   :  { %v206_v20 = vpack.c.bf16 %v202_v17, %v202_v17  ;;  %v207_v58 = vpack.c.bf16 %v203_v54, %v203_v54  ;;  %v1686_v10 = vld [vmem:[#allocation4 + $0x2d0] ss:$12 sps:$4 sm:$0xff]   ;;  %v1691_v11 = vld [vmem:[#allocation4 + $0x2ec] ss:$12 sps:$4 sm:$0xff]   ;;  %v1689_v12 = vld [vmem:[#allocation4 + $0x2e8] ss:$12 sps:$4 sm:$0xff]  }
 0x117   :  { %v208_v26 = vpack.c.bf16 %v204_v19, %v204_v19  ;;  %v1692_v13 = vld [vmem:[#allocation6 + $0x40] sm:$0xff]   ;;  %v1695_v16 = vld [vmem:[#allocation6 + $0x8] sm:$0xff]   ;;  %v1696_v17 = vld [vmem:[#allocation6 + $0x50] sm:$0xff]  }
 0x118   :  { %898 = vmatprep.mubr.bf16.mxu0 %v206_v20  ;;  %980 = vmatprep.mubr.bf16.mxu1 %v206_v20  ;;  %v1697_v18 = vld [vmem:[#allocation6 + $0x10] sm:$0xff]   ;;  %v1698_v19 = vld [vmem:[#allocation6 + $0x58] sm:$0xff]  }
 0x119   :  { %899 = vmatmul.mubr.bf16.vlgmr.msra.gmra.mrb[4].mxu0 %v205_v23  ;;  %981 = vmatmul.mubr.bf16.vlgmr.msra.gmra.mrb[4].mxu1 %v205_v23  ;;  %v1699_v20 = vld [vmem:[#allocation6 + $0x18] sm:$0xff]   ;;  %v1702_v23 = vld [vmem:[#allocation6 + $0x68] sm:$0xff]  }
 0x11a   :  { %908 = vmatpush1.bf16.msra.mxu0 %v1628_v21  ;;  %1472 = vmatpush3.bf16.msra.mxu1 %v1632_v22  ;;  %v1700_v21 = vld [vmem:[#allocation6 + $0x60] sm:$0xff]  }
 0x11b   :  { %909 = vmatprep.subr.bf16.mxu0 %v1635_v24  ;;  %1473 = vmatprep.subr.bf16.mxu1 %v1636_v25  ;;  %v1701_v22 = vld [vmem:[#allocation6 + $0x20] sm:$0xff]   ;;  %v1703_v24 = vld [vmem:[#allocation6 + $0x28] sm:$0xff]   ;;  %v1704_v25 = vld [vmem:[#allocation6 + $0x70] sm:$0xff]  }
 0x11c   :  { %1020 = vmatprep.mubr.bf16.mxu1 %v208_v26  ;;  %939 = vmatprep.mubr.bf16.mxu0 %v208_v26  ;;  %v1705_v26 = vld [vmem:[#allocation6 + $0x30] sm:$0xff]  }
 0x11e   :  { %910 = vmatpush1.bf16.msra.mxu0 %v1633_v27  ;;  %1474 = vmatpush3.bf16.msra.mxu1 %v1637_v28  ;;  %v1706_v27 = vld [vmem:[#allocation6 + $0x78] sm:$0xff]  }
 0x11f   :  { %911 = vmatprep.subr.bf16.mxu0 %v1640_v29  ;;  %1475 = vmatprep.subr.bf16.mxu1 %v1641_v30  ;;  %v1707_v28 = vld [vmem:[#allocation6 + $0x38] sm:$0xff]   ;;  %v1794_v29 = vmov 0.0  }
 0x122   :  { %912 = vmatpush1.bf16.msra.mxu0 %v1638_v31  ;;  %1476 = vmatpush3.bf16.msra.mxu1 %v1642_v32 }
 0x123   :  { %913 = vmatprep.subr.bf16.mxu0 %v1645_v33  ;;  %1477 = vmatprep.subr.bf16.mxu1 %v1646_v34 }
 0x126   :  { %914 = vmatpush1.bf16.msra.mxu0 %v1643_v35  ;;  %1478 = vmatpush3.bf16.msra.mxu1 %v1647_v36  ;;  %v337_v35 = vld [vmem:[%s1918_s4] sm:$0x7] }
 0x127   :  { %915 = vmatprep.subr.bf16.mxu0 %v1650_v37  ;;  %1479 = vmatprep.subr.bf16.mxu1 %v1651_v38  ;;  %v350_v36 = vrot.slane %v337_v35, %v82_v39 }
 0x12a   :  { %916 = vmatpush1.bf16.msra.mxu0 %v1648_v40  ;;  %1480 = vmatpush3.bf16.msra.mxu1 %v1652_v41 }
 0x12b   :  { %917 = vmatprep.subr.bf16.mxu0 %v1655_v42  ;;  %1481 = vmatprep.subr.bf16.mxu1 %v1656_v43 }
 0x12e   :  { %918 = vmatpush1.bf16.msra.mxu0 %v1653_v45  ;;  %1482 = vmatpush3.bf16.msra.mxu1 %v1657_v46  ;;  %v342_v45 = vrot.slane %v337_v35, %v74_v63  ;;  %v346_v46 = vrot.slane %v337_v35, %v78_v1  ;;  %v1711_v63 = vld [vmem:[#allocation6 + $0x98] sm:$0xff]   ;;  %v1712_v1 = vld [vmem:[#allocation6 + $0xa0] sm:$0xff]  }
 0x12f   :  { %919 = vmatprep.subr.bf16.mxu0 %v1660_v47  ;;  %1483 = vmatprep.subr.bf16.mxu1 %v1661_v48 }
 0x132   :  { %920 = vmatpush1.bf16.msra.mxu0 %v1658_v50  ;;  %1484 = vmatpush3.bf16.msra.mxu1 %v1662_v51 }
 0x133   :  { %921 = vmatprep.subr.bf16.mxu0 %v1665_v52  ;;  %1485 = vmatprep.subr.bf16.mxu1 %v1666_v53 }
 0x136   :  { %922 = vmatpush1.bf16.msra.mxu0 %v1663_v55  ;;  %1486 = vmatpush3.bf16.msra.mxu1 %v1667_v56  ;;  %v1708_v55 = vld [vmem:[#allocation6 + $0x80] sm:$0xff]  }
 0x137   :  { %923 = vmatprep.subr.bf16.mxu0 %v1670_v57  ;;  %1493 = vmatprep.subr.bf16.mxu1 %v1692_v13  ;;  %v1709_v57 = vld [vmem:[#allocation6 + $0x88] sm:$0xff]  }
 0x139   :  { %1021 = vmatmul.mubr.bf16.vlgmr.msra.gmra.mrb[8].mxu1 %v207_v58 }
 0x13a   :  { %924 = vmatpush1.bf16.msra.mxu0 %v1668_v59  ;;  %1494 = vmatpush3.bf16.msra.mxu1 %v1693_v14  ;;  %v1714_v59 = vld [vmem:[#allocation6 + $0xb0] sm:$0xff]  }
 0x13b   :  { %925 = vmatprep.subr.bf16.mxu0 %v1673_v60  ;;  %1495 = vmatprep.subr.bf16.mxu1 %v1694_v15  ;;  %v1715_v60 = vld [vmem:[#allocation6 + $0xb8] sm:$0xff]  }
 0x13e   :  { %926 = vmatpush1.bf16.msra.mxu0 %v1671_v61  ;;  %1496 = vmatpush3.bf16.msra.mxu1 %v1695_v16 }
 0x13f   :  { %927 = vmatprep.subr.bf16.mxu0 %v1676_v0  ;;  %1497 = vmatprep.subr.bf16.mxu1 %v1696_v17 }
 0x142   :  { %928 = vmatpush1.bf16.msra.mxu0 %v1674_v2  ;;  %1498 = vmatpush3.bf16.msra.mxu1 %v1697_v18 }
 0x143   :  { %929 = vmatprep.subr.bf16.mxu0 %v1679_v3  ;;  %1499 = vmatprep.subr.bf16.mxu1 %v1698_v19 }
 0x146   :  { %930 = vmatpush1.bf16.msra.mxu0 %v1677_v4  ;;  %1500 = vmatpush3.bf16.msra.mxu1 %v1699_v20 }
 0x147   :  { %931 = vmatprep.subr.bf16.mxu0 %v1682_v5  ;;  %1501 = vmatprep.subr.bf16.mxu1 %v1700_v21 }
 0x14a   :  { %932 = vmatpush1.bf16.msra.mxu0 %v1680_v6  ;;  %1502 = vmatpush3.bf16.msra.mxu1 %v1701_v22 }
 0x14b   :  { %933 = vmatprep.subr.bf16.mxu0 %v1685_v7  ;;  %1503 = vmatprep.subr.bf16.mxu1 %v1702_v23  ;;  %v1424_v7 = vld [vmem:[%s1920_s6] ss:$0 sm:$0xff] }
 0x14e   :  { %934 = vmatpush1.bf16.msra.mxu0 %v1683_v8  ;;  %1504 = vmatpush3.bf16.msra.mxu1 %v1703_v24 }
 0x14f   :  { %935 = vmatprep.subr.bf16.mxu0 %v1688_v9  ;;  %1505 = vmatprep.subr.bf16.mxu1 %v1704_v25 }
 0x152   :  { %936 = vmatpush1.bf16.msra.mxu0 %v1686_v10  ;;  %1506 = vmatpush3.bf16.msra.mxu1 %v1705_v26 }
 0x153   :  { %937 = vmatprep.subr.bf16.mxu0 %v1691_v11  ;;  %1507 = vmatprep.subr.bf16.mxu1 %v1706_v27 }
 0x156   :  { %938 = vmatpush1.bf16.msra.mxu0 %v1689_v12  ;;  %1508 = vmatpush3.bf16.msra.mxu1 %v1707_v28 }
 0x157   :  { %1524 = vmatprep.subr.bf16.mxu1 %v1794_v29 }
 0x159   :  { %940 = vmatmul.mubr.bf16.vlgmr.msra.gmra.mrb[4].mxu0 %v207_v58  ;;  %v1713_v58 = vld [vmem:[#allocation6 + $0xa8] sm:$0xff]  }
 0x1ec   :  { %v1465_v30 = vpop.f32.mrb[4].mxu1 }
 0x1ed   :  { %v1466_v31 = vpop.f32.mrb[5].mxu1 }
 0x1ee   :  { %v1467_v32 = vadd.f32 %v1466_v31, %v1465_v30  ;;  %v1468_v33 = vpop.f32.mrb[6].mxu1 }
 0x1ef   :  { %v1469_v34 = vpop.f32.mrb[7].mxu1 }
 0x1f0   :  { %v983_v40 = vadd.f32 %v1467_v32, %v350_v36 }
 0x20c   :  { %v1487_v37 = vpop.f32.mrb[8].mxu1 }
 0x20d   :  { %v1488_v38 = vpop.f32.mrb[9].mxu1 }
 0x20e   :  { %v1489_v41 = vadd.f32 %v1488_v38, %v1487_v37  ;;  %v1490_v42 = vpop.f32.mrb[10].mxu1 }
 0x20f   :  { %v1491_v43 = vpop.f32.mrb[11].mxu1 }
 0x210   :  { %v1023_v44 = vadd.f32 %v1489_v41, %v983_v40 }
 0x212   :  { %v1030_v61 = vmax.f32 %v1023_v44, 0.0 }
 0x214   :  { %v1033_v0 = vpack.c.bf16 %v1030_v61, %v1030_v61 }
 0x22c   :  { %v941_v47 = vpop.f32.mrb[4].mxu0 }
 0x22d   :  { %v1544_v48 = vadd.f32 %v941_v47, %v342_v45  ;;  %v943_v49 = vpop.f32.mrb[5].mxu0 }
 0x22e   :  { %v1545_v50 = vadd.f32 %v943_v49, %v346_v46  ;;  %v945_v51 = vpop.f32.mrb[6].mxu0 }
 0x22f   :  { %v1028_v52 = vmax.f32 %v1544_v48, 0.0  ;;  %v946_v39 = vpop.f32.mrb[7].mxu0 }
 0x230   :  { %v1029_v53 = vmax.f32 %v1545_v50, 0.0 }
 0x231   :  { %v1031_v56 = vpack.c.bf16 %v1028_v52, %v1028_v52 }
 0x232   :  { %v1032_v54 = vpack.c.bf16 %v1029_v53, %v1029_v53 }
 0x234   :  { %1265 = vmatprep.mubr.bf16.mxu1 %v1032_v54 }
 0x235   :  { %1266 = vmatmul.mubr.bf16.vlgmr.msra.gmra.mrb[12].mxu1 %v1031_v56 }
 0x236   :  { %1525 = vmatpush3.bf16.msra.mxu1 %v1708_v55  ;;  %1540 = vmatprep.mubr.msk.bf16.mxu1 %vm1795_vm2, %v1794_v29 }
 0x237   :  { %1526 = vmatprep.subr.bf16.mxu1 %v1794_v29 }
 0x23a   :  { %1527 = vmatpush3.bf16.msra.mxu1 %v1709_v57 }
 0x23b   :  { %1528 = vmatprep.subr.bf16.mxu1 %v1794_v29 }
 0x23e   :  { %1529 = vmatpush3.bf16.msra.mxu1 %v1710_v62 }
 0x23f   :  { %1530 = vmatprep.subr.bf16.mxu1 %v1794_v29 }
 0x242   :  { %1531 = vmatpush3.bf16.msra.mxu1 %v1711_v63 }
 0x243   :  { %1532 = vmatprep.subr.bf16.mxu1 %v1794_v29 }
 0x246   :  { %1533 = vmatpush3.bf16.msra.mxu1 %v1712_v1 }
 0x247   :  { %1534 = vmatprep.subr.bf16.mxu1 %v1794_v29 }
 0x24a   :  { %1535 = vmatpush3.bf16.msra.mxu1 %v1713_v58 }
 0x24b   :  { %1536 = vmatprep.subr.bf16.mxu1 %v1794_v29 }
 0x24e   :  { %1537 = vmatpush3.bf16.msra.mxu1 %v1714_v59 }
 0x24f   :  { %1538 = vmatprep.subr.bf16.mxu1 %v1794_v29 }
 0x252   :  { %1539 = vmatpush3.bf16.msra.mxu1 %v1715_v60 }
 0x255   :  { %1541 = vmatmul.mubr.bf16.vlgmr.msra.gmra.mrb[16].mxu1 %v1033_v0 }
 0x308   :  { %v1509_v2 = vpop.f32.mrb[12].mxu1 }
 0x309   :  { %v1510_v3 = vpop.f32.mrb[13].mxu1 }
 0x30a   :  { %v1511_v4 = vadd.f32 %v1510_v3, %v1509_v2  ;;  %v1512_v5 = vpop.f32.mrb[14].mxu1 }
 0x30b   :  { %v1513_v6 = vpop.f32.mrb[15].mxu1 }
 0x30c   :  { %v1268_v8 = vadd.f32 %v1511_v4, %v1424_v7 }
 0x328   :  { %v1307_v9 = vpop.f32.mrb[16].mxu1 }
 0x329   :  { %v1308_v10 = vadd.f32 %v1307_v9, %v1268_v8  ;;  %v1542_v11 = vpop.f32.mrb[17].mxu1 }
 0x32a   :  { %v1310_v12 = vpop.f32.mrb[18].mxu1 }
 0x32b   :  { %1313 = vst [vmem:[%s1921_s7] sm:$0xff] %v1308_v10  ;;  %v1543_v13 = vpop.f32.mrb[19].mxu1 }
 0x32c   :  { %1318 = vsyncpa [#allocation3], 1 }
 0x32d   :  { %1319 = vsyncpa [#allocation5], 1 }

</bundles_post_ra>
